<compile_context>
chip_gen: v7x
topology: tpu7x:2x2x1
jax: 0.10.0
libtpu: 0.0.40
codegen_flags: <defaults>
</compile_context>

<pallas_src>
import numpy as np
import jax
import jax.numpy as jnp
from jax.experimental import pallas as pl
from jax.experimental.pallas import tpu as pltpu


# ----------------------------------------------------------------------------
# Stage 1: fused embedding + input projection (both directions), bf16 output
# ----------------------------------------------------------------------------
def input_projection_kernel(x_ref, w_ref, gf_ref, gb_ref):
    # x_ref: (t_block*Bp, V) bf16, w_ref: (V, 2*Gp) bf16
    Gp = gf_ref.shape[-1]
    g = jnp.dot(x_ref[...], w_ref[...], preferred_element_type=jnp.float32)
    # 128-aligned lane split (Gp is a multiple of 128)
    gf_ref[...] = g[:, :Gp].astype(gf_ref.dtype)
    gb_ref[...] = g[:, Gp:].astype(gb_ref.dtype)


# ----------------------------------------------------------------------------
# Stage 2: serial bidirectional LSTM recurrence + fused heads
# ----------------------------------------------------------------------------
def lstm_recurrence_kernel(len_ref, gf_ref, gb_ref, whh_f_ref, whh_b_ref,
                           b_ref, w_heads_ref, b_heads_ref, out_ref, state_ref):
    i = pl.program_id(0)
    n = pl.num_programs(0)
    rows, Gp = gf_ref.shape
    Hp = Gp // 4
    Bp = state_ref.shape[0]
    TB = rows // Bp
    T = n * TB

    @pl.when(i == 0)
    def _():
        state_ref[...] = jnp.zeros_like(state_ref)

    # --- hoisted once per grid step (off the serial chain) -------------------
    lens = jnp.broadcast_to(len_ref[...], (Bp, Hp))          # (Bp, Hp) int32
    whh_f = whh_f_ref[...]                                   # (Hp, Gp) bf16
    whh_b = whh_b_ref[...]
    # upcast whole block once + add bias in f32 (gf/gb travel as bf16 in HBM);
    # per-timestep slices below are then 8-row aligned f32 sublane windows.
    gf_all = gf_ref[...].astype(jnp.float32) + b_ref[0:1, :]  # (TB*Bp, Gp)
    gb_all = gb_ref[...].astype(jnp.float32) + b_ref[1:2, :]

    # lane-dense merged state scratch: [h_f | h_b | c_f | c_b], each Hp wide
    h_f = state_ref[:, 0 * Hp:1 * Hp]
    h_b = state_ref[:, 1 * Hp:2 * Hp]
    c_f = state_ref[:, 2 * Hp:3 * Hp]
    c_b = state_ref[:, 3 * Hp:4 * Hp]

    def cell(g, c):
        # every gate slice is a 128-aligned, Hp(=multiple of 128)-wide window:
        # whole vregs, no cross-lane relayout on the serial chain.
        ig = jax.nn.sigmoid(g[:, 0 * Hp:1 * Hp])
        fg = jax.nn.sigmoid(g[:, 1 * Hp:2 * Hp])
        gg = jnp.tanh(g[:, 2 * Hp:3 * Hp])
        og = jax.nn.sigmoid(g[:, 3 * Hp:4 * Hp])
        c_new = fg * c + ig * gg
        return og * jnp.tanh(c_new), c_new

    # statically unrolled: only the serial h@Whh dot remains per direction; the
    # fwd/bwd chains are independent so their MXU/EUP/VPU work interleaves.
    # TODO(synk): on v7x the two directions could be split across the two
    # TensorCores via pl.core_map + CMEM exchange for ~2x; single-core here.
    for s in range(TB):
        t = i * TB + s            # forward absolute timestep
        t_rev = T - 1 - t         # backward absolute timestep

        g = gf_all[s * Bp:(s + 1) * Bp, :] + jnp.dot(
            h_f.astype(jnp.bfloat16), whh_f, preferred_element_type=jnp.float32)
        hn, cn = cell(g, c_f)
        mf = t < lens
        h_f = jnp.where(mf, hn, h_f)
        c_f = jnp.where(mf, cn, c_f)

        # gb block arrives already time-reversed at block granularity
        # (index_map nblk-1-i); reverse locally within the block.
        g = gb_all[(TB - 1 - s) * Bp:(TB - s) * Bp, :] + jnp.dot(
            h_b.astype(jnp.bfloat16), whh_b, preferred_element_type=jnp.float32)
        hn, cn = cell(g, c_b)
        mb = t_rev < lens
        h_b = jnp.where(mb, hn, h_b)
        c_b = jnp.where(mb, cn, c_b)

    state = jnp.concatenate([h_f, h_b, c_f, c_b], axis=-1)   # 128-aligned placement
    state_ref[...] = state

    # Output block index is constant across the grid -> buffer stays resident;
    # only written on the last step.
    @pl.when(i == n - 1)
    def _():
        out_ref[...] = (jnp.dot(state.astype(jnp.bfloat16), w_heads_ref[...],
                                preferred_element_type=jnp.float32)
                        + b_heads_ref[...])                  # (Bp, 2*Hp) = [h|c]


# ----------------------------------------------------------------------------
# Tile sizing helpers (VMEM budgeted so the tiling also fits v7x's 64 MiB)
# ----------------------------------------------------------------------------
def _vmem_estimate(tb, Bp, V, Hp):
    Gp = 4 * Hp
    rows = tb * Bp
    # stage 1: x blocks + resident w_in + gf/gb output blocks (double-buffered)
    s1 = 2 * rows * V * 2 + 2 * V * 2 * Gp * 2 + 4 * rows * Gp * 2
    # stage 2: gf/gb bf16 blocks (double-buffered) + their f32 upcast temps
    #          + whh/w_heads/biases + state scratch + output
    s2 = (4 * rows * Gp * 2 + 2 * rows * Gp * 4
          + 4 * Hp * Gp * 2 + 4 * Hp * 2 * Hp * 2 * 2
          + Bp * 4 * Hp * 4 + 2 * Bp * 2 * Hp * 4)
    return max(s1, s2)


def _pick_t_block(T, Bp, V, Hp, requested, budget=24 * 2**20):
    best = 1
    for tb in range(1, T + 1):
        if T % tb == 0 and tb <= requested and _vmem_estimate(tb, Bp, V, Hp) <= budget:
            best = tb
    return best


# ----------------------------------------------------------------------------
# Wrapper
# ----------------------------------------------------------------------------
def encoder_forward(x, lengths, p, *, t_block=32):
    B, T, V = x.shape
    H, Hp = p['H'], p['Hp']
    Gp = 4 * Hp
    Bp = max(8, ((B + 7) // 8) * 8)      # pad batch to the sublane tile

    tb = _pick_t_block(T, Bp, V, Hp, t_block)
    nblk = T // tb
    rows_blk = tb * Bp

    # batch padding: padded rows get zero inputs and length 0 (sliced away below)
    x_p = jnp.zeros((Bp, T, V), x.dtype).at[:B].set(x)
    len_p = jnp.zeros((Bp, 1), jnp.int32).at[:B, 0].set(lengths.astype(jnp.int32))

    # time-major, flattened, bf16: stage 1 runs one 2-D GEMM per block
    x_rows = jnp.transpose(x_p, (1, 0, 2)).reshape(T * Bp, V).astype(jnp.bfloat16)

    est = _vmem_estimate(tb, Bp, V, Hp)
    vmem_limit = int(min(48 * 2**20, max(32 * 2**20, 2 * est)))
    cp_par = pltpu.CompilerParams(dimension_semantics=("parallel",),
                                  vmem_limit_bytes=vmem_limit)
    cp_ser = pltpu.CompilerParams(dimension_semantics=("arbitrary",),
                                  vmem_limit_bytes=vmem_limit)

    # ---- stage 1: fused embedding + input projection, gridded over T blocks --
    # TODO(synk): for vocab-scale V, block the V reduction axis (or run this
    # dense GEMM in plain XLA) instead of keeping w_in fully VMEM-resident.
    gf, gb = pl.pallas_call(
        input_projection_kernel,
        grid=(nblk,),
        in_specs=[pl.BlockSpec((rows_blk, V), lambda j: (j, 0)),
                  pl.BlockSpec((V, 2 * Gp), lambda j: (0, 0))],
        out_specs=(pl.BlockSpec((rows_blk, Gp), lambda j: (j, 0)),
                   pl.BlockSpec((rows_blk, Gp), lambda j: (j, 0))),
        out_shape=(jax.ShapeDtypeStruct((T * Bp, Gp), jnp.bfloat16),
                   jax.ShapeDtypeStruct((T * Bp, Gp), jnp.bfloat16)),
        compiler_params=cp_par,
    )(x_rows, p['w_in'])

    # ---- stage 2: serial recurrence, gridded over T blocks (pipelined DMA) ---
    out = pl.pallas_call(
        lstm_recurrence_kernel,
        grid=(nblk,),
        in_specs=[pl.BlockSpec((Bp, 1), lambda i: (0, 0)),                    # lengths
                  pl.BlockSpec((rows_blk, Gp), lambda i: (i, 0)),             # gf: fwd
                  pl.BlockSpec((rows_blk, Gp), lambda i: (nblk - 1 - i, 0)),  # gb: bwd
                  pl.BlockSpec((Hp, Gp), lambda i: (0, 0)),                   # whh_f
                  pl.BlockSpec((Hp, Gp), lambda i: (0, 0)),                   # whh_b
                  pl.BlockSpec((2, Gp), lambda i: (0, 0)),                    # biases
                  pl.BlockSpec((4 * Hp, 2 * Hp), lambda i: (0, 0)),           # w_heads
                  pl.BlockSpec((1, 2 * Hp), lambda i: (0, 0))],               # b_heads
        out_specs=pl.BlockSpec((Bp, 2 * Hp), lambda i: (0, 0)),
        out_shape=jax.ShapeDtypeStruct((Bp, 2 * Hp), jnp.float32),
        scratch_shapes=[pltpu.VMEM((Bp, 4 * Hp), jnp.float32)],
        compiler_params=cp_ser,
    )(len_p, gf, gb, p['whh_f'], p['whh_b'], p['b_in'], p['w_heads'], p['b_heads'])

    return out[:B, :H], out[:B, Hp:Hp + H]


# ----------------------------------------------------------------------------
# Params: PyTorch-style init, then folded into the fused, gate-padded layout
# ----------------------------------------------------------------------------
def init_params(key, vocab, emb_size, hidden):
    ks = jax.random.split(key, 13)
    s = 1.0 / np.sqrt(hidden)
    u = lambda k, shape: jax.random.uniform(k, shape, jnp.float32, -s, s)
    sl = 1.0 / np.sqrt(2 * hidden)
    ul = lambda k, shape: jax.random.uniform(k, shape, jnp.float32, -sl, sl)

    # TODO(synk): nn.Embedding and nn.Dropout are defined in __init__ but never
    # used in forward() — not materialized here.
    emb = jax.random.normal(ks[0], (vocab, emb_size), jnp.float32)
    wih_f = u(ks[1], (4 * hidden, emb_size))     # PyTorch (4H, E), gates [i,f,g,o]
    whh_f = u(ks[2], (4 * hidden, hidden))       # (4H, H)
    b_f = u(ks[3], (4 * hidden,)) + u(ks[4], (4 * hidden,))   # b_ih + b_hh
    wih_b = u(ks[5], (4 * hidden, emb_size))
    whh_b = u(ks[6], (4 * hidden, hidden))
    b_b = u(ks[7], (4 * hidden,)) + u(ks[8], (4 * hidden,))
    wh = ul(ks[9], (hidden, 2 * hidden))         # Linear (out, in)
    bh = ul(ks[10], (hidden,))
    wc = ul(ks[11], (hidden, 2 * hidden))
    bc = ul(ks[12], (hidden,))

    raw = dict(emb=emb, wih_f=wih_f, whh_f=whh_f, b_f=b_f,
               wih_b=wih_b, whh_b=whh_b, b_b=b_b, wh=wh, bh=bh, wc=wc, bc=bc)

    H = hidden
    Hp = H if H % 128 == 0 else ((H + 127) // 128) * 128   # gate stride padded to 128
    Gp = 4 * Hp

    def pad_gate_cols(w):           # (rows, 4H) -> (rows, Gp), gate k at k*Hp
        out = jnp.zeros((w.shape[0], Gp), jnp.float32)
        for k in range(4):
            out = out.at[:, k * Hp:k * Hp + H].set(w[:, k * H:(k + 1) * H])
        return out

    def pad_rows(w):                # (H, Gp) -> (Hp, Gp)
        return jnp.zeros((Hp, Gp), jnp.float32).at[:H].set(w)

    # Fold embedding into the LSTM input projection: (x@emb)@Wih^T == x@(emb@Wih^T)
    w_in = jnp.concatenate([pad_gate_cols(emb @ wih_f.T),
                            pad_gate_cols(emb @ wih_b.T)], axis=1)   # (V, 2*Gp)
    # gate biases added in f32 in stage 2 (row 0 = fwd, row 1 = bwd)
    b_in = jnp.stack([pad_gate_cols(b_f.reshape(1, -1))[0],
                      pad_gate_cols(b_b.reshape(1, -1))[0]])         # (2, Gp)

    whh_f_p = pad_rows(pad_gate_cols(whh_f.T))   # (Hp, Gp)
    whh_b_p = pad_rows(pad_gate_cols(whh_b.T))

    # Both Linear heads fused into one block-diagonal (4Hp, 2Hp) matmul applied
    # to the merged state [h_f | h_b | c_f | c_b] (each Hp wide, valid [0:H]).
    w_heads = jnp.zeros((4 * Hp, 2 * Hp), jnp.float32)
    w_heads = w_heads.at[0:H, 0:H].set(wh.T[0:H])
    w_heads = w_heads.at[Hp:Hp + H, 0:H].set(wh.T[H:2 * H])
    w_heads = w_heads.at[2 * Hp:2 * Hp + H, Hp:Hp + H].set(wc.T[0:H])
    w_heads = w_heads.at[3 * Hp:3 * Hp + H, Hp:Hp + H].set(wc.T[H:2 * H])
    b_heads = jnp.zeros((1, 2 * Hp), jnp.float32)
    b_heads = b_heads.at[0, 0:H].set(bh).at[0, Hp:Hp + H].set(bc)

    params = dict(
        w_in=w_in.astype(jnp.bfloat16),          # (V, 2*Gp) bf16
        b_in=b_in,                               # (2, Gp) f32
        whh_f=whh_f_p.astype(jnp.bfloat16),      # (Hp, Gp) bf16
        whh_b=whh_b_p.astype(jnp.bfloat16),
        w_heads=w_heads.astype(jnp.bfloat16),    # (4Hp, 2Hp) bf16
        b_heads=b_heads,                         # (1, 2Hp) f32
        H=H, Hp=Hp,
    )
    return params, raw


# ----------------------------------------------------------------------------
# References
#  (a) mirror of the kernel's padded layout / precision (tight tolerance)
#  (b) plain f32 math from raw PyTorch-style params (loose tolerance; validates
#      the folding / padding / head-fusion transforms themselves)
# ----------------------------------------------------------------------------
def reference_forward_padded(x, lengths, p):
    H, Hp = p['H'], p['Hp']
    Gp = 4 * Hp
    B, T, V = x.shape
    g_all = jnp.einsum('btv,vg->btg', x.astype(jnp.bfloat16), p['w_in'],
                       preferred_element_type=jnp.float32).astype(jnp.bfloat16)
    gf_all = g_all[..., :Gp].astype(jnp.float32) + p['b_in'][0]
    gb_all = g_all[..., Gp:].astype(jnp.float32) + p['b_in'][1]
    L = lengths.astype(jnp.int32).reshape(B, 1)

    def cell(g, c):
        ig = jax.nn.sigmoid(g[:, :Hp]); fg = jax.nn.sigmoid(g[:, Hp:2 * Hp])
        gg = jnp.tanh(g[:, 2 * Hp:3 * Hp]); og = jax.nn.sigmoid(g[:, 3 * Hp:])
        cn = fg * c + ig * gg
        return og * jnp.tanh(cn), cn

    hf = cf = hb = cb = jnp.zeros((B, Hp), jnp.float32)
    for t in range(T):
        g = gf_all[:, t] + jnp.dot(hf.astype(jnp.bfloat16), p['whh_f'],
                                   preferred_element_type=jnp.float32)
        hn, cn = cell(g, cf)
        m = t < L
        hf = jnp.where(m, hn, hf); cf = jnp.where(m, cn, cf)

        t_rev = T - 1 - t
        g = gb_all[:, t_rev] + jnp.dot(hb.astype(jnp.bfloat16), p['whh_b'],
                                       preferred_element_type=jnp.float32)
        hn, cn = cell(g, cb)
        m = t_rev < L
        hb = jnp.where(m, hn, hb); cb = jnp.where(m, cn, cb)

    state = jnp.concatenate([hf, hb, cf, cb], axis=-1)
    out = jnp.dot(state.astype(jnp.bfloat16), p['w_heads'],
                  preferred_element_type=jnp.float32) + p['b_heads']
    return out[:, :H], out[:, Hp:Hp + H]


def reference_forward_f32(x, lengths, raw):
    B, T, V = x.shape
    H = raw['whh_f'].shape[1]
    e = x @ raw['emb']                      # (B, T, E)
    L = lengths.astype(jnp.int32).reshape(B, 1)

    def cell(g, c):
        i_, f_, g_, o_ = jnp.split(g, 4, axis=-1)
        i_ = jax.nn.sigmoid(i_); f_ = jax.nn.sigmoid(f_)
        g_ = jnp.tanh(g_); o_ = jax.nn.sigmoid(o_)
        cn = f_ * c + i_ * g_
        return o_ * jnp.tanh(cn), cn

    hf = cf = hb = cb = jnp.zeros((B, H), jnp.float32)
    for t in range(T):
        g = e[:, t] @ raw['wih_f'].T + raw['b_f'] + hf @ raw['whh_f'].T
        hn, cn = cell(g, cf)
        m = t < L
        hf = jnp.where(m, hn, hf); cf = jnp.where(m, cn, cf)

        t_rev = T - 1 - t
        g = e[:, t_rev] @ raw['wih_b'].T + raw['b_b'] + hb @ raw['whh_b'].T
        hn, cn = cell(g, cb)
        m = t_rev < L
        hb = jnp.where(m, hn, hb); cb = jnp.where(m, cn, cb)

    h = jnp.concatenate([hf, hb], -1) @ raw['wh'].T + raw['bh']
    c = jnp.concatenate([cf, cb], -1) @ raw['wc'].T + raw['bc']
    return h, c


if __name__ == "__main__":
    B, T, VOCAB, EMB, HIDDEN = 2, 8, 32, 16, 32

    key = jax.random.PRNGKey(0)
    k_x, k_p = jax.random.split(key)
    params, raw = init_params(k_p, VOCAB, EMB, HIDDEN)

    # x is a "soft one-hot" float tensor (B, T, vocab); lengths sorted desc
    # (pack_padded_sequence with enforce_sorted=True requires this).
    x = jax.random.normal(k_x, (B, T, VOCAB), jnp.float32)
    lengths = jnp.array([8, 5], dtype=jnp.int32)

    h_ref, c_ref = reference_forward_padded(x, lengths, params)
    h_f32, c_f32 = reference_forward_f32(x, lengths, raw)

    # t_block=4 exercises the multi-block grid (reversed gb blocks, scratch
    # carry); t_block=32 clamps to one big block (the recommended large-tile path).
    for t_block in (4, 32):
        h, c = encoder_forward(x, lengths, params, t_block=t_block)
        jax.block_until_ready((h, c))
        np.testing.assert_allclose(np.asarray(h), np.asarray(h_ref), rtol=2e-3, atol=2e-3)
        np.testing.assert_allclose(np.asarray(c), np.asarray(c_ref), rtol=2e-3, atol=2e-3)
        np.testing.assert_allclose(np.asarray(h), np.asarray(h_f32), rtol=1e-1, atol=1e-1)
        np.testing.assert_allclose(np.asarray(c), np.asarray(c_f32), rtol=1e-1, atol=1e-1)

    print("KERNEL_OK")
</pallas_src>

<mosaic_0001>
module attributes {stable_mosaic.version = 11 : i64} {
  func.func @input_projection_kernel(%arg0: i32, %arg1: memref<32x32xbf16, #tpu.memory_space<vmem>>, %arg2: memref<32x1024xbf16, #tpu.memory_space<vmem>>, %arg3: memref<32x512xbf16, #tpu.memory_space<vmem>>, %arg4: memref<32x512xbf16, #tpu.memory_space<vmem>>) attributes {dimension_semantics = [#tpu.dimension_semantics<parallel>], iteration_bounds = array<i64: 2>, scalar_prefetch = 0 : i64, scratch_operands = 0 : i64, tpu.core_type = #tpu.core_type<tc>, window_params = [{transform_indices = @transform_0, window_bounds = array<i64: 32, 32>}, {pipeline_mode = #tpu.pipeline_mode<synchronous>, transform_indices = @transform_1, window_bounds = array<i64: 32, 1024>}, {transform_indices = @transform_2, window_bounds = array<i64: 32, 512>}, {transform_indices = @transform_3, window_bounds = array<i64: 32, 512>}]} {
    %c0 = arith.constant 0 : index
    %c0_0 = arith.constant 0 : index
    %0 = vector.load %arg1[%c0, %c0_0] : memref<32x32xbf16, #tpu.memory_space<vmem>>, vector<32x32xbf16>
    %c0_1 = arith.constant 0 : index
    %c0_2 = arith.constant 0 : index
    %1 = vector.load %arg2[%c0_1, %c0_2] : memref<32x1024xbf16, #tpu.memory_space<vmem>>, vector<32x1024xbf16>
    %cst = arith.constant dense<0.000000e+00> : vector<32x1024xf32>
    %2 = tpu.matmul %0, %1, %cst {dimension_numbers = #tpu.dot_dimension_numbers<[1], [0], [0], [1], [0, 0, 1, 1], [], []>} : vector<32x32xbf16>, vector<32x1024xbf16>, vector<32x1024xf32> -> vector<32x1024xf32>
    %3 = vector.extract_strided_slice %2 {offsets = [0, 0], sizes = [32, 512], strides = [1, 1]} : vector<32x1024xf32> to vector<32x512xf32>
    %4 = arith.truncf %3 : vector<32x512xf32> to vector<32x512xbf16>
    %c0_3 = arith.constant 0 : index
    %c0_4 = arith.constant 0 : index
    %5 = vector.load %arg3[%c0_3, %c0_4] : memref<32x512xbf16, #tpu.memory_space<vmem>>, vector<32x512xbf16>
    tpu.vector_store %arg3[%c0_3, %c0_4], %4 {strides = array<i32>} : memref<32x512xbf16, #tpu.memory_space<vmem>>, vector<32x512xbf16>,
    %6 = vector.extract_strided_slice %2 {offsets = [0, 512], sizes = [32, 512], strides = [1, 1]} : vector<32x1024xf32> to vector<32x512xf32>
    %7 = arith.truncf %6 : vector<32x512xf32> to vector<32x512xbf16>
    %c0_5 = arith.constant 0 : index
    %c0_6 = arith.constant 0 : index
    %8 = vector.load %arg4[%c0_5, %c0_6] : memref<32x512xbf16, #tpu.memory_space<vmem>>, vector<32x512xbf16>
    tpu.vector_store %arg4[%c0_5, %c0_6], %7 {strides = array<i32>} : memref<32x512xbf16, #tpu.memory_space<vmem>>, vector<32x512xbf16>,
    return
  }
  func.func @transform_0(%arg0: i32) -> (i32, i32) {
    %c0_i32 = arith.constant 0 : i32
    %c0_i32_0 = arith.constant 0 : i32
    return %arg0, %c0_i32 : i32, i32
  }
  func.func @transform_1(%arg0: i32) -> (i32, i32) {
    %c0_i32 = arith.constant 0 : i32
    %c0_i32_0 = arith.constant 0 : i32
    %c0_i32_1 = arith.constant 0 : i32
    return %c0_i32, %c0_i32_0 : i32, i32
  }
  func.func @transform_2(%arg0: i32) -> (i32, i32) {
    %c0_i32 = arith.constant 0 : i32
    %c0_i32_0 = arith.constant 0 : i32
    return %arg0, %c0_i32 : i32, i32
  }
  func.func @transform_3(%arg0: i32) -> (i32, i32) {
    %c0_i32 = arith.constant 0 : i32
    %c0_i32_0 = arith.constant 0 : i32
    return %arg0, %c0_i32 : i32, i32
  }
}

</mosaic_0001>

<bundles_post_ra>
// kernel: tpu_custom_call.1
= control target key start
LH: loop header
LB: loop body
LE: loop exit
PB: predicated region body
PF: predicated region fallthrough
CT: control target
= control target key end

     0   :  { %9 = vsyncpa [#allocation3], 0  ;;  %s1289_s0 = inlined_call_operand.vmem [shape: bf16[64,32], index: 0, kind: input, shape index: {}]   ;;  %s1290_s1 = inlined_call_operand.hbm [shape: bf16[32,1024], index: 1, kind: input, shape index: {}]   ;;  %s1291_s2 = inlined_call_operand.hbm [shape: bf16[64,512], index: 2, kind: output, shape index: {0}]   ;;  %s1292_s3 = inlined_call_operand.hbm [shape: bf16[64,512], index: 3, kind: output, shape index: {1}]  }
   0x1   :  { %10 = vsyncpa [#allocation4], 0 }
   0x2   :  { %12 = vsyncpa [#allocation4 + $0x1], 0 }
   0x3   :  { %13 = vsyncpa [#allocation7], 0 }
   0x4   :  { %15 = vsyncpa [#allocation7 + $0x1], 0  ;;  %s1084_s12 = smov 0   ;;  %s1086_s13 = smov 0  }
   0x5   :  { %s1088_s14 = smov 0   ;;  %s1090_s15 = smov 0  }
   0x6 LB: > { %s1105_s16 = sadd.s32 4294967295, %s1054_s15   ;;  %s784_s17 = sadd.s32 4294967294, %s1054_s15   ;;  %s1054_s15 = sphi %s1090_s15, %s1308_s15   ;;  %s1050_s14 = sphi %s1088_s14, %s1307_s14   ;;  %s1046_s13 = sphi %s1086_s13, %s1306_s13   ;;  %s1042_s12 = sphi %s1084_s12, %s1305_s12  }
   0x7   : > { %s1109_s18 = sadd.s32 1, %s1054_s15   ;;  %s75_s19 = sadd.s32 1, %s1050_s14 }
   0x8   : > { %s72_s20 = ssub.s32 %s1054_s15, %s1109_s18  ;;  %p85_p0 = scmp.ne.s32.totalorder %s1050_s14, %s1046_s13 }
   0x9   : > { %p73_p1 = scmp.eq.s32.totalorder %s72_s20, 0  ;;  %p86_p2 = scmp.eq.s32.totalorder %s1105_s16, 1 }
   0xa   : > { %p91_p3 = scmp.ne.s32.totalorder %s1046_s13, %s1042_s12  ;;  %p92_p4 = scmp.eq.s32.totalorder %s784_s17, 1 }
   0xb   : > { %s1120_s21 = scalar_select %p73_p1, %s1050_s14, %s75_s19  }
   0xc   : > { %p1122_p5 = por %p86_p2, %p85_p0  ;;  %p1126_p6 = por %p92_p4, %p91_p3 }
   0xd   : > { %p785_p7 = scmp.ge.s32.totalorder %s1054_s15, 1  ;;  %p125_p8 = scmp.lt.s32.totalorder %s1054_s15, 3 }
   0xe   : > { %s1296_s22 = scalar_select %p1122_p5, 1, 0 }
   0xf   : > { %s1297_s23 = scalar_select %p1126_p6, 1, 0 }
  0x10   : > { %p1293_p9 = scmp.eq.s32.totalorder %s1105_s16, 0  ;;  %p1133_p10 = pnand %p785_p7, %p125_p8 }
  0x11   : > { %s1056_s25 = smov [#allocation2]   ;;  %s928_s30 = scalar_lea.hbm %s1290_s1, 2048 }
  0x12   : > { %s1298_s24 = scalar_select %p1133_p10, 1, 0 }
  0x13   : > { %s137_s26 = sshll.u32 %s1056_s25, 4  ;;  %p874_p11 = pneg %p1133_p10  ;;  %s138_s26 = int_to_ptr.vmem [resolvable:$true] %s137_s26 }
  0x14   : > { %p929_p13 = scmp.ne.s32.totalorder %s1290_s1, %s928_s30  ;;  %p935_p3 = scmp.lt.u32.totalorder %s928_s30, %s1290_s1 }
  0x15   : > { %p1141_p12 = pnand %p1293_p9, %p874_p11 }
  0x17   : > { %p930_p0 = pneg %p1141_p12 }
  0x19   : > { %p931_p1 = pnand %p930_p0, %p929_p13 }
  0x1b   : > { %p932_p2 = pneg %p931_p1 }
  0x1d   : > { %p937_p4 = pnand %p935_p3, %p932_p2 }
  0x1f   : > { %940 = shalt.err (!%p937_p4)
}
  0x20   : > { %s941_s8 = scalar_lea.vmem %s138_s26, 2048  ;;  %p949_p9 = scmp.lt.s32.totalorder %s138_s26, %s138_s26 }
  0x21   : > { %p942_p7 = scmp.ne.s32.totalorder %s138_s26, %s941_s8  ;;  %p950_p6 = scmp.lt.s32.totalorder %s941_s8, %s941_s8 }
  0x23   : > { %p944_p8 = pnand %p942_p7, %p930_p0  ;;  %p951_p5 = por %p950_p6, %p949_p9 }
  0x25   : > { %p945_p11 = pneg %p944_p8 }
  0x27   : > { %p952_p10 = pnand %p951_p5, %p945_p11 }
  0x29   : > { %955 = shalt.err (!%p952_p10)
}
  0x2a   : > { %s1057_s9 = smov 512   ;;  %s1058_s10 = smov 32  }
  0x2b   : > { %877 = dma.hbm_to_vmem [thread:$0]  (!%p1141_p12), %s1290_s1, 2048, %s138_s26, [#allocation3], %s1057_s9, %s1057_s9, %s1058_s10  }
  0x2c   : > { %p1300_p13 = scmp.ne.s32.totalorder %s1298_s24, 0 }
  0x2d   : > { %p1301_p1 = scmp.eq.s32.totalorder (!%p1300_p13), %s1105_s16, 0 }
  0x2e   : > { %162 = sbr.rel (%p1300_p13) target bundleno = 332 (0x14c), region = 28 }
  0x35   : > { %1029 = dma.done.wait (%p1301_p1), [#allocation3], 2048   ;;  %p1302_p0 = pmov %p1301_p1 }
  0x36   : > { %s792_s19 = sshll.u32 %s1105_s16, 2  ;;  %v1059_v0 = vmov 0   ;;  %v204_v1 = vld [vmem:[#allocation2] sm:$0xff]  ;;  %v205_v3 = vld [vmem:[#allocation2 + $0x8] sm:$0xff]  ;;  %v206_v15 = vld [vmem:[#allocation2 + $0x10] sm:$0xff]  ;;  %vm310_vm0 = vcmask 261120  }
  0x37   : > { %1031 = vsyncadd (%p1302_p0), [#allocation3], 4294965248  ;;  %349 = vmatprep.mubr.bf16.mxu0 %v1059_v0  ;;  %402 = vmatprep.mubr.bf16.mxu1 %v1059_v0  ;;  %p192_p5 = scmp.lt.s32.totalorder %s792_s19, 7  ;;  %v208_v2 = vld [vmem:[#allocation2 + $0x20] sm:$0xff]  ;;  %v209_v5 = vld [vmem:[#allocation2 + $0x28] sm:$0xff]  ;;  %s1192_s27 = sand.u32 1, %s1046_s13  }
  0x38   : > { %v797_v4 = vcombine.high %v204_v1, %v208_v2  ;;  %v796_v6 = vcombine.low %v204_v1, %v208_v2  ;;  %v212_v7 = vld [vmem:[#allocation2 + $0x40] sm:$0xff]  ;;  %v799_v9 = vcombine.high %v205_v3, %v209_v5  ;;  %v798_v10 = vcombine.low %v205_v3, %v209_v5  ;;  %v213_v12 = vld [vmem:[#allocation2 + $0x48] sm:$0xff]  ;;  %v210_v17 = vld [vmem:[#allocation2 + $0x30] sm:$0xff]  ;;  %s790_s28 = sshll.u32 %s1192_s27, 6  ;;  %s863_s4 = sshll.u32 %s1105_s16, 10 }
  0x39   : > { %s1310_s19 = smov (!%p192_p5, %s792_s19), 7  ;;  %v216_v8 = vld [vmem:[#allocation2 + $0x60] sm:$0xff]  ;;  %v217_v13 = vld [vmem:[#allocation2 + $0x68] sm:$0xff]  ;;  %v207_v18 = vld [vmem:[#allocation2 + $0x18] sm:$0xff]  ;;  %v801_v21 = vcombine.high %v206_v15, %v210_v17  ;;  %v800_v26 = vcombine.low %v206_v15, %v210_v17  ;;  %s183_s29 = scalar_lea.vmem [#allocation5], %s790_s28 }
  0x3a   : > { %s793_s20 = sshll.u32 %s1310_s19, 2  ;;  %v805_v11 = vcombine.high %v212_v7, %v216_v8  ;;  %317 = vmatprep.subr.bf16.mxu0 %v797_v4  ;;  %v807_v14 = vcombine.high %v213_v12, %v217_v13  ;;  %370 = vmatprep.subr.bf16.mxu1 %v799_v9  ;;  %v804_v16 = vcombine.low %v212_v7, %v216_v8  ;;  %v211_v19 = vld [vmem:[#allocation2 + $0x38] sm:$0xff]  ;;  %v214_v24 = vld [vmem:[#allocation2 + $0x50] sm:$0xff]  ;;  %s661_s30 = sshll.u32 %s183_s29, 4  ;;  %s1198_s30 = int_to_ptr.vmem [resolvable:$true] %s661_s30 }
  0x3b   : > { %s1173_s26 = scalar_lea.vmem %s1289_s0, %s793_s20  ;;  %318 = vmatpush1.bf16.msra.mxu0 %v796_v6  ;;  %371 = vmatpush1.bf16.msra.mxu1 %v798_v10  ;;  %v806_v20 = vcombine.low %v213_v12, %v217_v13  ;;  %v803_v22 = vcombine.high %v207_v18, %v211_v19  ;;  %v218_v25 = vld [vmem:[#allocation2 + $0x70] sm:$0xff]  ;;  %v215_v27 = vld [vmem:[#allocation2 + $0x58] sm:$0xff]  ;;  %v802_v29 = vcombine.low %v207_v18, %v211_v19  ;;  %s1205_s7 = scalar_lea.hbm %s1291_s2, %s863_s4 }
  0x3c   : > { %319 = vmatprep.subr.bf16.mxu0 %v805_v11  ;;  %372 = vmatprep.subr.bf16.mxu1 %v807_v14  ;;  %v926_v23 = vld [vmem:[%s1173_s26] sm:$0xff]   ;;  %v219_v28 = vld [vmem:[#allocation2 + $0x78] sm:$0xff]  ;;  %v809_v30 = vcombine.high %v214_v24, %v218_v25  ;;  %v808_v32 = vcombine.low %v214_v24, %v218_v25  ;;  %v927_v34 = vld [vmem:[%s1173_s26 + $0x8] sm:$0xff]   ;;  %s642_s8 = scalar_lea.sflag [#allocation4], %s1192_s27  ;;  %s956_s9 = scalar_lea.vmem %s1198_s30, 1024 }
  0x3d   : > { %v811_v31 = vcombine.high %v215_v27, %v219_v28  ;;  %v810_v33 = vcombine.low %v215_v27, %v219_v28  ;;  %p957_p6 = scmp.ne.s32.totalorder %s1198_s30, %s956_s9  ;;  %p1303_p9 = scmp.ne.s32.totalorder %s1296_s22, 0 }
  0x3e   : > { %s1060_s10 = smov [#allocation5]  }
  0x3f   : > { %320 = vmatpush1.bf16.msra.mxu0 %v804_v16  ;;  %373 = vmatpush1.bf16.msra.mxu1 %v806_v20  ;;  %p958_p10 = pnand %p957_p6, %p1303_p9  ;;  %s960_s11 = sshll.u32 %s1060_s10, 4  ;;  %s961_s11 = int_to_ptr.vmem [resolvable:$false] %s960_s11 }
  0x40   : > { %423 = vmatprep.subr.bf16.mxu0 %v801_v21  ;;  %476 = vmatprep.subr.bf16.mxu1 %v803_v22  ;;  %s962_s17 = scalar_lea.vmem %s961_s11, 2048  ;;  %p963_p2 = scmp.lt.s32.totalorder %s1198_s30, %s961_s11 }
  0x41   : > { %p959_p12 = pneg %p958_p10  ;;  %p964_p3 = scmp.lt.s32.totalorder %s962_s17, %s956_s9 }
  0x42   : > { %812 = vmatmul.mubr.msk.bf16.vlgmr.msra.gmra.mrb[0].mxu0 %vm310_vm0, %v926_v23  ;;  %814 = vmatmul.mubr.msk.bf16.vlgmr.msra.gmra.mrb[0].mxu1 %vm310_vm0, %v926_v23 }
  0x43   : > { %424 = vmatpush1.bf16.msra.mxu0 %v800_v26  ;;  %477 = vmatpush1.bf16.msra.mxu1 %v802_v29  ;;  %p965_p4 = por %p964_p3, %p963_p2 }
  0x44   : > { %359 = vmatprep.mubr.bf16.mxu0 %v1059_v0  ;;  %412 = vmatprep.mubr.bf16.mxu1 %v1059_v0 }
  0x45   : > { %425 = vmatprep.subr.bf16.mxu0 %v809_v30  ;;  %478 = vmatprep.subr.bf16.mxu1 %v811_v31  ;;  %p966_p7 = pnand %p965_p4, %p959_p12 }
  0x47   : > { %426 = vmatpush1.bf16.msra.mxu0 %v808_v32  ;;  %479 = vmatpush1.bf16.msra.mxu1 %v810_v33 }
  0x4a   : > { %813 = vmatmul.mubr.msk.bf16.gmra.mrb[4].mxu0 %vm310_vm0, %v927_v34  ;;  %815 = vmatmul.mubr.msk.bf16.gmra.mrb[4].mxu1 %vm310_vm0, %v927_v34 }
  0x4b   : > { %455 = vmatprep.mubr.bf16.mxu0 %v1059_v0  ;;  %508 = vmatprep.mubr.bf16.mxu1 %v1059_v0 }
  0x52   : > { %816 = vmatmul.mubr.msk.bf16.vlgmr.msra.gmra.mrb[8].mxu0 %vm310_vm0, %v926_v23  ;;  %818 = vmatmul.mubr.msk.bf16.vlgmr.msra.gmra.mrb[8].mxu1 %vm310_vm0, %v926_v23 }
  0x53   : > { %465 = vmatprep.mubr.bf16.mxu0 %v1059_v0  ;;  %518 = vmatprep.mubr.bf16.mxu1 %v1059_v0 }
  0x5a   : > { %817 = vmatmul.mubr.msk.bf16.gmra.mrb[12].mxu0 %vm310_vm0, %v927_v34  ;;  %819 = vmatmul.mubr.msk.bf16.gmra.mrb[12].mxu1 %vm310_vm0, %v927_v34 }
 0x115   : > { %v351_v35 = vpop.f32.mrb[0].mxu0  ;;  %v404_v36 = vpop.f32.mrb[0].mxu1 }
 0x116   : > { %v353_v37 = vpop.f32.mrb[1].mxu0  ;;  %v406_v39 = vpop.f32.mrb[1].mxu1 }
 0x117   : > { %v846_v38 = vpack.c.bf16 %v353_v37, %v351_v35  ;;  %v355_v40 = vpop.f32.mrb[2].mxu0  ;;  %v847_v41 = vpack.c.bf16 %v406_v39, %v404_v36  ;;  %v408_v42 = vpop.f32.mrb[2].mxu1 }
 0x118   : > { %v357_v43 = vpop.f32.mrb[3].mxu0  ;;  %v410_v45 = vpop.f32.mrb[3].mxu1 }
 0x119   : > { %577 = vst [vmem:[%s183_s29] sm:$0xff] %v846_v38  ;;  %v848_v44 = vpack.c.bf16 %v357_v43, %v355_v40  ;;  %578 = vst [vmem:[%s183_s29 + $0x8] sm:$0xff] %v847_v41  ;;  %v849_v46 = vpack.c.bf16 %v410_v45, %v408_v42 }
 0x11b   : > { %579 = vst [vmem:[%s183_s29 + $0x10] sm:$0xff] %v848_v44  ;;  %580 = vst [vmem:[%s183_s29 + $0x18] sm:$0xff] %v849_v46 }
 0x11d   : > { %v361_v47 = vpop.f32.mrb[4].mxu0  ;;  %v414_v48 = vpop.f32.mrb[4].mxu1 }
 0x11e   : > { %v363_v49 = vpop.f32.mrb[5].mxu0  ;;  %v416_v51 = vpop.f32.mrb[5].mxu1 }
 0x11f   : > { %v850_v50 = vpack.c.bf16 %v363_v49, %v361_v47  ;;  %v365_v52 = vpop.f32.mrb[6].mxu0  ;;  %v851_v53 = vpack.c.bf16 %v416_v51, %v414_v48  ;;  %v418_v54 = vpop.f32.mrb[6].mxu1 }
 0x120   : > { %v367_v55 = vpop.f32.mrb[7].mxu0  ;;  %v420_v57 = vpop.f32.mrb[7].mxu1 }
 0x121   : > { %581 = vst [vmem:[%s183_s29 + $0x20] sm:$0xff] %v850_v50  ;;  %v852_v56 = vpack.c.bf16 %v367_v55, %v365_v52  ;;  %582 = vst [vmem:[%s183_s29 + $0x28] sm:$0xff] %v851_v53  ;;  %v853_v58 = vpack.c.bf16 %v420_v57, %v418_v54 }
 0x123   : > { %583 = vst [vmem:[%s183_s29 + $0x30] sm:$0xff] %v852_v56  ;;  %584 = vst [vmem:[%s183_s29 + $0x38] sm:$0xff] %v853_v58 }
 0x125   : > { %v457_v59 = vpop.f32.mrb[8].mxu0 }
 0x126   : > { %969 = shalt.err (!%p966_p7)
}
 0x127   : > { %s970_s19 = scalar_lea.hbm %s1205_s7, 1024  ;;  %s974_s25 = scalar_lea.hbm %s1291_s2, 2048 }
 0x128   : > { %p971_p8 = scmp.ne.s32.totalorder %s1205_s7, %s970_s19  ;;  %p975_p1 = scmp.lt.u32.totalorder %s1205_s7, %s1291_s2 }
 0x129   : > { %p976_p0 = scmp.lt.u32.totalorder %s974_s25, %s970_s19  ;;  %p978_p6 = scmp.lt.u32.totalorder %s970_s19, %s1205_s7 }
 0x12a   : > { %p972_p11 = pnand %p971_p8, %p1303_p9 }
 0x12b   : > { %p977_p5 = por %p976_p0, %p975_p1 }
 0x12c   : > { %p973_p13 = pneg %p972_p11 }
 0x12d   : > { %p979_p10 = por %p978_p6, %p977_p5 }
 0x12f   : > { %p980_p12 = pnand %p979_p10, %p973_p13 }
 0x131   : > { %983 = shalt.err (!%p980_p12)
}
 0x132   : > { %s1061_s5 = smov 256   ;;  %s1062_s6 = smov 16   ;;  %v510_v60 = vpop.f32.mrb[8].mxu1  ;;  %v459_v61 = vpop.f32.mrb[9].mxu0 }
 0x133   : > { %870 = dma.vmem_to_hbm [thread:$0]  (%p1303_p9), %s1198_s30, 1024, %s1205_s7, %s642_s8, %s1061_s5, %s1061_s5, %s1062_s6   ;;  %v854_v62 = vpack.c.bf16 %v459_v61, %v457_v59  ;;  %v512_v63 = vpop.f32.mrb[9].mxu1  ;;  %v461_v0 = vpop.f32.mrb[10].mxu0 }
 0x134   : > { %v855_v1 = vpack.c.bf16 %v512_v63, %v510_v60  ;;  %v514_v2 = vpop.f32.mrb[10].mxu1  ;;  %v463_v3 = vpop.f32.mrb[11].mxu0  ;;  %s190_s9 = scalar_lea.vmem [#allocation6], %s790_s28  ;;  %s1243_s8 = scalar_lea.hbm %s1292_s3, %s863_s4 }
 0x135   : > { %633 = vst [vmem:[%s190_s9] sm:$0xff] %v854_v62  ;;  %v856_v4 = vpack.c.bf16 %v463_v3, %v461_v0  ;;  %v516_v5 = vpop.f32.mrb[11].mxu1  ;;  %v467_v7 = vpop.f32.mrb[12].mxu0  ;;  %s678_s30 = sshll.u32 %s190_s9, 4  ;;  %s647_s10 = scalar_lea.sflag [#allocation7], %s1192_s27  ;;  %s1236_s30 = int_to_ptr.vmem [resolvable:$true] %s678_s30 }
 0x136   : > { %634 = vst [vmem:[%s190_s9 + $0x8] sm:$0xff] %v855_v1  ;;  %v857_v6 = vpack.c.bf16 %v516_v5, %v514_v2  ;;  %v520_v8 = vpop.f32.mrb[12].mxu1  ;;  %v469_v9 = vpop.f32.mrb[13].mxu0  ;;  %s984_s11 = scalar_lea.vmem %s1236_s30, 1024  ;;  %s1063_s17 = smov [#allocation6]  }
 0x137   : > { %635 = vst [vmem:[%s190_s9 + $0x10] sm:$0xff] %v856_v4  ;;  %v858_v10 = vpack.c.bf16 %v469_v9, %v467_v7  ;;  %v522_v11 = vpop.f32.mrb[13].mxu1  ;;  %v471_v12 = vpop.f32.mrb[14].mxu0  ;;  %p985_p2 = scmp.ne.s32.totalorder %s1236_s30, %s984_s11  ;;  %s988_s19 = sshll.u32 %s1063_s17, 4  ;;  %s989_s19 = int_to_ptr.vmem [resolvable:$false] %s988_s19 }
 0x138   : > { %636 = vst [vmem:[%s190_s9 + $0x18] sm:$0xff] %v857_v6  ;;  %v859_v13 = vpack.c.bf16 %v522_v11, %v520_v8  ;;  %v524_v14 = vpop.f32.mrb[14].mxu1  ;;  %v473_v15 = vpop.f32.mrb[15].mxu0  ;;  %s990_s20 = scalar_lea.vmem %s989_s19, 2048  ;;  %p991_p7 = scmp.lt.s32.totalorder %s1236_s30, %s989_s19 }
 0x139   : > { %637 = vst [vmem:[%s190_s9 + $0x20] sm:$0xff] %v858_v10  ;;  %v860_v16 = vpack.c.bf16 %v473_v15, %v471_v12  ;;  %v526_v17 = vpop.f32.mrb[15].mxu1  ;;  %p986_p3 = pnand %p985_p2, %p1303_p9  ;;  %p992_p8 = scmp.lt.s32.totalorder %s990_s20, %s984_s11 }
 0x13a   : > { %638 = vst [vmem:[%s190_s9 + $0x28] sm:$0xff] %v859_v13  ;;  %v861_v18 = vpack.c.bf16 %v526_v17, %v524_v14 }
 0x13b   : > { %639 = vst [vmem:[%s190_s9 + $0x30] sm:$0xff] %v860_v16  ;;  %p987_p4 = pneg %p986_p3  ;;  %p993_p11 = por %p992_p8, %p991_p7 }
 0x13c   : > { %640 = vst [vmem:[%s190_s9 + $0x38] sm:$0xff] %v861_v18 }
 0x13d   : > { %p994_p13 = pnand %p993_p11, %p987_p4 }
 0x13f   : > { %997 = shalt.err (!%p994_p13)
}
 0x140   : > { %s998_s16 = scalar_lea.hbm %s1243_s8, 1024  ;;  %s1002_s25 = scalar_lea.hbm %s1292_s3, 2048 }
 0x141   : > { %p999_p1 = scmp.ne.s32.totalorder %s1243_s8, %s998_s16  ;;  %p1003_p6 = scmp.lt.u32.totalorder %s1243_s8, %s1292_s3 }
 0x142   : > { %p1004_p10 = scmp.lt.u32.totalorder %s1002_s25, %s998_s16  ;;  %p1006_p2 = scmp.lt.u32.totalorder %s998_s16, %s1243_s8 }
 0x143   : > { %p1000_p0 = pnand %p999_p1, %p1303_p9 }
 0x144   : > { %p1005_p12 = por %p1004_p10, %p1003_p6 }
 0x145   : > { %p1001_p5 = pneg %p1000_p0 }
 0x146   : > { %p1007_p3 = por %p1006_p2, %p1005_p12 }
 0x148   : > { %p1008_p4 = pnand %p1007_p3, %p1001_p5 }
 0x14a   : > { %1011 = shalt.err (!%p1008_p4)
}
 0x14b   : > { %871 = dma.vmem_to_hbm [thread:$0]  (%p1303_p9), %s1236_s30, 1024, %s1243_s8, %s647_s10, %s1061_s5, %s1061_s5, %s1062_s6  }
 0x14c PF: > { %p887_p7 = scmp.ge.s32.totalorder %s1054_s15, 2  ;;  %s693_s9 = sand.u32 1, %s1042_s12  }
 0x14d   : > { %p1304_p8 = scmp.ne.s32.totalorder %s1297_s23, 0  ;;  %s694_s28 = scalar_lea.sflag [#allocation4], %s693_s9 }
 0x14f   : > { %p879_p11 = pnand %p887_p7, %p1304_p8 }
 0x151   : > { %1033 = dma.done.wait (!%p879_p11), %s694_s28, 1024  }
 0x152   : > { %1035 = vsyncadd (!%p879_p11), %s694_s28, 4294966272  ;;  %s703_s22 = scalar_lea.sflag [#allocation7], %s693_s9 }
 0x153   : > { %1037 = dma.done.wait (!%p879_p11), %s703_s22, 1024  }
 0x154   : > { %1039 = vsyncadd (!%p879_p11), %s703_s22, 4294966272  ;;  %p18_p9 = scmp.ge.s32.totalorder %s1109_s18, 4   ;;  %s1305_s12 = smov %s1046_s13 }
 0x155   : > { %s1306_s13 = smov %s1050_s14  ;;  %s1307_s14 = smov %s1120_s21 }
 0x156   : > { %s1308_s15 = smov %s1109_s18  ;;  %20 = sbr.rel (!%p18_p9) target bundleno = 6 (0x6), region = 85 }
 0x15d   :  { %708 = vsyncpa [#allocation3], 1 }
 0x15e   :  { %710 = vsyncpa [#allocation3 + $0x1], 1 }
 0x15f   :  { %711 = vsyncpa [#allocation4], 1 }
 0x160   :  { %713 = vsyncpa [#allocation4 + $0x1], 1 }
 0x161   :  { %714 = vsyncpa [#allocation7], 1 }
 0x162   :  { %716 = vsyncpa [#allocation7 + $0x1], 1 }

</bundles_post_ra>
